<compile_context>
chip_gen: v7x
topology: tpu7x:2x2x1
jax: 0.10.0
libtpu: 0.0.40
codegen_flags: <defaults>
</compile_context>

<pallas_src>
import jax
import jax.numpy as jnp
import numpy as np
from jax.experimental import pallas as pl
from jax.experimental.pallas import tpu as pltpu

NEG_SLOPE = 0.01  # nn.LeakyReLU() default


def _leaky_relu(x):
    return jnp.where(x >= 0, x, NEG_SLOPE * x)


def make_mlp_rl_kernel(E):
    """E is the embed dim; the per-e column extraction is a static unroll."""

    def kernel(eb_ref, time_ref, node_ref, w1_ref, b1_ref,
               wspa_ref, bspa_ref, wtem_ref, btem_ref,
               w3_ref, b3_ref, out_ref):
        x = eb_ref[0]            # (T*N, D_IN)   rows for this batch element
        node = node_ref[...]     # (T*N, E)      node_eb tiled over T
        tvec = time_ref[0]       # (T*N, E)      time_eb[b, t] broadcast over N

        # ---- ln1 : eb_out = eb @ W1^T + b1 ----
        h1 = jnp.dot(x, w1_ref[...],
                     preferred_element_type=jnp.float32) + b1_ref[...]   # (R, H)

        # ---- spatial adaptive layer: single K = E*H matmul ----
        # xs[:, e*H + i] = node[:, e] * h1[:, i]   (matches wspa.reshape(E*H, H))
        xs = jnp.concatenate([node[:, e:e + 1] * h1 for e in range(E)],
                             axis=-1)                                     # (R, E*H)
        out_spa = jnp.dot(xs, wspa_ref[...],
                          preferred_element_type=jnp.float32) \
            + jnp.dot(node, bspa_ref[...],
                      preferred_element_type=jnp.float32)                 # (R, H)
        out_spa = _leaky_relu(out_spa)

        # ---- temporal adaptive layer: single K = E*H matmul ----
        xt = jnp.concatenate([tvec[:, e:e + 1] * out_spa for e in range(E)],
                             axis=-1)                                     # (R, E*H)
        out_tem = jnp.dot(xt, wtem_ref[...],
                          preferred_element_type=jnp.float32) \
            + jnp.dot(tvec, btem_ref[...],
                      preferred_element_type=jnp.float32)                 # (R, H)
        out_tem = _leaky_relu(out_tem)

        # ---- ln3 ----
        logits = jnp.dot(out_tem, w3_ref[...],
                         preferred_element_type=jnp.float32) + b3_ref[...]
        out_ref[0] = logits.astype(out_ref.dtype)                         # (R, D_OUT)

    return kernel


def mlp_rl_forward(eb, time_eb, node_eb, params):
    B, T, N, D_IN = eb.shape
    E = node_eb.shape[1]
    H = params["w1"].shape[0]          # ln1 weight: (hidden, dim_in)
    D_OUT = params["w3"].shape[0]      # ln3 weight: (dim_out, hidden)
    R = T * N                          # rows per grid step

    # ---- wrapper-side layout plumbing (cheap / metadata-only ops) ----
    eb_r = eb.reshape(B, R, D_IN)                                        # (B, R, D_IN)
    time_rep = jnp.broadcast_to(time_eb[:, :, None, :],
                                (B, T, N, E)).reshape(B, R, E)           # (B, R, E)
    node_rep = jnp.tile(node_eb, (T, 1))                                 # (R, E)
    w1_t = params["w1"].T                                                # (D_IN, H)
    b1 = params["b1"].reshape(1, H)
    w3_t = params["w3"].T                                                # (H, D_OUT)
    b3 = params["b3"].reshape(1, D_OUT)
    wspa_flat = params["wp_spa"].reshape(E * H, H)                       # (E*H, H)
    wtem_flat = params["wp_tem"].reshape(E * H, H)                       # (E*H, H)

    kernel = make_mlp_rl_kernel(E)

    def full2(shape):
        # grid-invariant operand: same block every step -> fetched once.
        # TODO(synk): at production sizes (large E*H*H) consider single-
        # buffering these pools / tiling the E*H axis to stay inside v7x's
        # 64 MiB VMEM; at these shapes they are a few KiB and fit trivially.
        return pl.BlockSpec(shape, lambda b: (0, 0))

    out = pl.pallas_call(
        kernel,
        out_shape=jax.ShapeDtypeStruct((B, R, D_OUT), jnp.float32),
        grid=(B,),
        in_specs=[
            pl.BlockSpec((1, R, D_IN), lambda b: (b, 0, 0)),   # eb rows for batch b
            pl.BlockSpec((1, R, E), lambda b: (b, 0, 0)),      # time_eb broadcast over N
            full2((R, E)),          # node_eb tiled over T
            full2((D_IN, H)),       # W1^T
            full2((1, H)),          # b1
            full2((E * H, H)),      # weights_pool_spa (flattened)
            full2((E, H)),          # bias_pool_spa
            full2((E * H, H)),      # weights_pool_tem (flattened)
            full2((E, H)),          # bias_pool_tem
            full2((H, D_OUT)),      # W3^T
            full2((1, D_OUT)),      # b3
        ],
        out_specs=pl.BlockSpec((1, R, D_OUT), lambda b: (b, 0, 0)),
        compiler_params=pltpu.CompilerParams(
            dimension_semantics=("parallel",)),
    )(eb_r, time_rep, node_rep, w1_t, b1,
      wspa_flat, params["bp_spa"], wtem_flat, params["bp_tem"], w3_t, b3)

    return out.reshape(B, T, N, D_OUT)


def mlp_rl_reference(eb, time_eb, node_eb, params):
    """Pure-JAX reference mirroring the PyTorch forward exactly."""
    eb_out = jnp.einsum('btni,hi->btnh', eb, params["w1"]) + params["b1"]
    weights_spa = jnp.einsum('nd,dio->nio', node_eb, params["wp_spa"])
    bias_spa = node_eb @ params["bp_spa"]
    out_spa = jnp.einsum('btni,nio->btno', eb_out, weights_spa) + bias_spa
    out_spa = jnp.where(out_spa >= 0, out_spa, NEG_SLOPE * out_spa)
    weights_tem = jnp.einsum('btd,dio->btio', time_eb, params["wp_tem"])
    bias_tem = (time_eb @ params["bp_tem"])[:, :, None, :]
    out_tem = jnp.einsum('btni,btio->btno', out_spa, weights_tem) + bias_tem
    out_tem = jnp.where(out_tem >= 0, out_tem, NEG_SLOPE * out_tem)
    logits = jnp.einsum('btnh,oh->btno', out_tem, params["w3"]) + params["b3"]
    return logits


if __name__ == "__main__":
    # small shapes consistent with the module
    B, T, N = 2, 4, 8
    DIM_IN, HIDDEN, EMBED, DIM_OUT = 16, 32, 8, 4

    key = jax.random.PRNGKey(0)
    ks = jax.random.split(key, 12)

    def rnd(k, shape, scale):
        return jax.random.normal(k, shape, jnp.float32) * scale

    params = {
        "w1": rnd(ks[0], (HIDDEN, DIM_IN), 1.0 / np.sqrt(DIM_IN)),
        "b1": rnd(ks[1], (HIDDEN,), 0.1),
        "wp_spa": rnd(ks[2], (EMBED, HIDDEN, HIDDEN), 1.0 / np.sqrt(EMBED * HIDDEN)),
        "bp_spa": rnd(ks[3], (EMBED, HIDDEN), 0.1),
        "wp_tem": rnd(ks[4], (EMBED, HIDDEN, HIDDEN), 1.0 / np.sqrt(EMBED * HIDDEN)),
        "bp_tem": rnd(ks[5], (EMBED, HIDDEN), 0.1),
        "w3": rnd(ks[6], (DIM_OUT, HIDDEN), 1.0 / np.sqrt(HIDDEN)),
        "b3": rnd(ks[7], (DIM_OUT,), 0.1),
    }

    eb = rnd(ks[8], (B, T, N, DIM_IN), 1.0)
    time_eb = rnd(ks[9], (B, T, EMBED), 1.0)
    node_eb = rnd(ks[10], (N, EMBED), 1.0)

    out = mlp_rl_forward(eb, time_eb, node_eb, params)
    out = jax.block_until_ready(out)

    ref = jax.block_until_ready(mlp_rl_reference(eb, time_eb, node_eb, params))
    np.testing.assert_allclose(np.asarray(out), np.asarray(ref), rtol=1e-2, atol=1e-2)

    print("KERNEL_OK")
</pallas_src>

<mosaic_0001>
module attributes {stable_mosaic.version = 11 : i64} {
  func.func @kernel(%arg0: i32, %arg1: memref<1x32x16xf32, #tpu.memory_space<vmem>>, %arg2: memref<1x32x8xf32, #tpu.memory_space<vmem>>, %arg3: memref<32x8xf32, #tpu.memory_space<vmem>>, %arg4: memref<16x32xf32, #tpu.memory_space<vmem>>, %arg5: memref<1x32xf32, #tpu.memory_space<vmem>>, %arg6: memref<256x32xf32, #tpu.memory_space<vmem>>, %arg7: memref<8x32xf32, #tpu.memory_space<vmem>>, %arg8: memref<256x32xf32, #tpu.memory_space<vmem>>, %arg9: memref<8x32xf32, #tpu.memory_space<vmem>>, %arg10: memref<32x4xf32, #tpu.memory_space<vmem>>, %arg11: memref<1x4xf32, #tpu.memory_space<vmem>>, %arg12: memref<1x32x4xf32, #tpu.memory_space<vmem>>) attributes {dimension_semantics = [#tpu.dimension_semantics<parallel>], iteration_bounds = array<i64: 2>, scalar_prefetch = 0 : i64, scratch_operands = 0 : i64, tpu.core_type = #tpu.core_type<tc>, window_params = [{transform_indices = @transform_0, window_bounds = array<i64: 1, 32, 16>}, {transform_indices = @transform_1, window_bounds = array<i64: 1, 32, 8>}, {pipeline_mode = #tpu.pipeline_mode<synchronous>, transform_indices = @transform_2, window_bounds = array<i64: 32, 8>}, {pipeline_mode = #tpu.pipeline_mode<synchronous>, transform_indices = @transform_3, window_bounds = array<i64: 16, 32>}, {pipeline_mode = #tpu.pipeline_mode<synchronous>, transform_indices = @transform_4, window_bounds = array<i64: 1, 32>}, {pipeline_mode = #tpu.pipeline_mode<synchronous>, transform_indices = @transform_5, window_bounds = array<i64: 256, 32>}, {pipeline_mode = #tpu.pipeline_mode<synchronous>, transform_indices = @transform_6, window_bounds = array<i64: 8, 32>}, {pipeline_mode = #tpu.pipeline_mode<synchronous>, transform_indices = @transform_7, window_bounds = array<i64: 256, 32>}, {pipeline_mode = #tpu.pipeline_mode<synchronous>, transform_indices = @transform_8, window_bounds = array<i64: 8, 32>}, {pipeline_mode = #tpu.pipeline_mode<synchronous>, transform_indices = @transform_9, window_bounds = array<i64: 32, 4>}, {pipeline_mode = #tpu.pipeline_mode<synchronous>, transform_indices = @transform_10, window_bounds = array<i64: 1, 4>}, {transform_indices = @transform_11, window_bounds = array<i64: 1, 32, 4>}]} {
    %c0 = arith.constant 0 : index
    %c0_0 = arith.constant 0 : index
    %c0_1 = arith.constant 0 : index
    %0 = vector.load %arg1[%c0, %c0_0, %c0_1] : memref<1x32x16xf32, #tpu.memory_space<vmem>>, vector<1x32x16xf32>
    %1 = vector.shape_cast %0 : vector<1x32x16xf32> to vector<32x16xf32>
    %c0_2 = arith.constant 0 : index
    %c0_3 = arith.constant 0 : index
    %2 = vector.load %arg3[%c0_2, %c0_3] : memref<32x8xf32, #tpu.memory_space<vmem>>, vector<32x8xf32>
    %c0_4 = arith.constant 0 : index
    %c0_5 = arith.constant 0 : index
    %c0_6 = arith.constant 0 : index
    %3 = vector.load %arg2[%c0_4, %c0_5, %c0_6] : memref<1x32x8xf32, #tpu.memory_space<vmem>>, vector<1x32x8xf32>
    %4 = vector.shape_cast %3 : vector<1x32x8xf32> to vector<32x8xf32>
    %c0_7 = arith.constant 0 : index
    %c0_8 = arith.constant 0 : index
    %5 = vector.load %arg4[%c0_7, %c0_8] : memref<16x32xf32, #tpu.memory_space<vmem>>, vector<16x32xf32>
    %cst = arith.constant dense<0.000000e+00> : vector<32x32xf32>
    %6 = tpu.matmul %1, %5, %cst {dimension_numbers = #tpu.dot_dimension_numbers<[1], [0], [0], [1], [0, 0, 1, 1], [], []>} : vector<32x16xf32>, vector<16x32xf32>, vector<32x32xf32> -> vector<32x32xf32>
    %c0_9 = arith.constant 0 : index
    %c0_10 = arith.constant 0 : index
    %7 = vector.load %arg5[%c0_9, %c0_10] : memref<1x32xf32, #tpu.memory_space<vmem>>, vector<1x32xf32>
    %8 = vector.broadcast %7 : vector<1x32xf32> to vector<32x32xf32>
    %9 = arith.addf %6, %8 : vector<32x32xf32>
    %10 = vector.extract_strided_slice %2 {offsets = [0, 0], sizes = [32, 1], strides = [1, 1]} : vector<32x8xf32> to vector<32x1xf32>
    %11 = vector.broadcast %10 : vector<32x1xf32> to vector<32x32xf32>
    %12 = arith.mulf %11, %9 : vector<32x32xf32>
    %13 = vector.extract_strided_slice %2 {offsets = [0, 1], sizes = [32, 1], strides = [1, 1]} : vector<32x8xf32> to vector<32x1xf32>
    %14 = vector.broadcast %13 : vector<32x1xf32> to vector<32x32xf32>
    %15 = arith.mulf %14, %9 : vector<32x32xf32>
    %16 = vector.extract_strided_slice %2 {offsets = [0, 2], sizes = [32, 1], strides = [1, 1]} : vector<32x8xf32> to vector<32x1xf32>
    %17 = vector.broadcast %16 : vector<32x1xf32> to vector<32x32xf32>
    %18 = arith.mulf %17, %9 : vector<32x32xf32>
    %19 = vector.extract_strided_slice %2 {offsets = [0, 3], sizes = [32, 1], strides = [1, 1]} : vector<32x8xf32> to vector<32x1xf32>
    %20 = vector.broadcast %19 : vector<32x1xf32> to vector<32x32xf32>
    %21 = arith.mulf %20, %9 : vector<32x32xf32>
    %22 = vector.extract_strided_slice %2 {offsets = [0, 4], sizes = [32, 1], strides = [1, 1]} : vector<32x8xf32> to vector<32x1xf32>
    %23 = vector.broadcast %22 : vector<32x1xf32> to vector<32x32xf32>
    %24 = arith.mulf %23, %9 : vector<32x32xf32>
    %25 = vector.extract_strided_slice %2 {offsets = [0, 5], sizes = [32, 1], strides = [1, 1]} : vector<32x8xf32> to vector<32x1xf32>
    %26 = vector.broadcast %25 : vector<32x1xf32> to vector<32x32xf32>
    %27 = arith.mulf %26, %9 : vector<32x32xf32>
    %28 = vector.extract_strided_slice %2 {offsets = [0, 6], sizes = [32, 1], strides = [1, 1]} : vector<32x8xf32> to vector<32x1xf32>
    %29 = vector.broadcast %28 : vector<32x1xf32> to vector<32x32xf32>
    %30 = arith.mulf %29, %9 : vector<32x32xf32>
    %31 = vector.extract_strided_slice %2 {offsets = [0, 7], sizes = [32, 1], strides = [1, 1]} : vector<32x8xf32> to vector<32x1xf32>
    %32 = vector.broadcast %31 : vector<32x1xf32> to vector<32x32xf32>
    %33 = arith.mulf %32, %9 : vector<32x32xf32>
    %34 = tpu.concatenate %12, %15, %18, %21, %24, %27, %30, %33 in 1 : vector<32x32xf32>, vector<32x32xf32>, vector<32x32xf32>, vector<32x32xf32>, vector<32x32xf32>, vector<32x32xf32>, vector<32x32xf32>, vector<32x32xf32> -> vector<32x256xf32>
    %c0_11 = arith.constant 0 : index
    %c0_12 = arith.constant 0 : index
    %35 = vector.load %arg6[%c0_11, %c0_12] : memref<256x32xf32, #tpu.memory_space<vmem>>, vector<256x32xf32>
    %cst_13 = arith.constant dense<0.000000e+00> : vector<32x32xf32>
    %36 = tpu.matmul %34, %35, %cst_13 {dimension_numbers = #tpu.dot_dimension_numbers<[1], [0], [0], [1], [0, 0, 1, 1], [], []>} : vector<32x256xf32>, vector<256x32xf32>, vector<32x32xf32> -> vector<32x32xf32>
    %c0_14 = arith.constant 0 : index
    %c0_15 = arith.constant 0 : index
    %37 = vector.load %arg7[%c0_14, %c0_15] : memref<8x32xf32, #tpu.memory_space<vmem>>, vector<8x32xf32>
    %cst_16 = arith.constant dense<0.000000e+00> : vector<32x32xf32>
    %38 = tpu.matmul %2, %37, %cst_16 {dimension_numbers = #tpu.dot_dimension_numbers<[1], [0], [0], [1], [0, 0, 1, 1], [], []>} : vector<32x8xf32>, vector<8x32xf32>, vector<32x32xf32> -> vector<32x32xf32>
    %39 = arith.addf %36, %38 : vector<32x32xf32>
    %cst_17 = arith.constant 0.000000e+00 : f32
    %40 = vector.broadcast %cst_17 : f32 to vector<32x32xf32>
    %41 = arith.cmpf oge, %39, %40 : vector<32x32xf32>
    %cst_18 = arith.constant 0.00999999977 : f32
    %42 = vector.broadcast %cst_18 : f32 to vector<32x32xf32>
    %43 = arith.mulf %42, %39 : vector<32x32xf32>
    %44 = arith.select %41, %39, %43 : vector<32x32xi1>, vector<32x32xf32>
    %45 = vector.extract_strided_slice %4 {offsets = [0, 0], sizes = [32, 1], strides = [1, 1]} : vector<32x8xf32> to vector<32x1xf32>
    %46 = vector.broadcast %45 : vector<32x1xf32> to vector<32x32xf32>
    %47 = arith.mulf %46, %44 : vector<32x32xf32>
    %48 = vector.extract_strided_slice %4 {offsets = [0, 1], sizes = [32, 1], strides = [1, 1]} : vector<32x8xf32> to vector<32x1xf32>
    %49 = vector.broadcast %48 : vector<32x1xf32> to vector<32x32xf32>
    %50 = arith.mulf %49, %44 : vector<32x32xf32>
    %51 = vector.extract_strided_slice %4 {offsets = [0, 2], sizes = [32, 1], strides = [1, 1]} : vector<32x8xf32> to vector<32x1xf32>
    %52 = vector.broadcast %51 : vector<32x1xf32> to vector<32x32xf32>
    %53 = arith.mulf %52, %44 : vector<32x32xf32>
    %54 = vector.extract_strided_slice %4 {offsets = [0, 3], sizes = [32, 1], strides = [1, 1]} : vector<32x8xf32> to vector<32x1xf32>
    %55 = vector.broadcast %54 : vector<32x1xf32> to vector<32x32xf32>
    %56 = arith.mulf %55, %44 : vector<32x32xf32>
    %57 = vector.extract_strided_slice %4 {offsets = [0, 4], sizes = [32, 1], strides = [1, 1]} : vector<32x8xf32> to vector<32x1xf32>
    %58 = vector.broadcast %57 : vector<32x1xf32> to vector<32x32xf32>
    %59 = arith.mulf %58, %44 : vector<32x32xf32>
    %60 = vector.extract_strided_slice %4 {offsets = [0, 5], sizes = [32, 1], strides = [1, 1]} : vector<32x8xf32> to vector<32x1xf32>
    %61 = vector.broadcast %60 : vector<32x1xf32> to vector<32x32xf32>
    %62 = arith.mulf %61, %44 : vector<32x32xf32>
    %63 = vector.extract_strided_slice %4 {offsets = [0, 6], sizes = [32, 1], strides = [1, 1]} : vector<32x8xf32> to vector<32x1xf32>
    %64 = vector.broadcast %63 : vector<32x1xf32> to vector<32x32xf32>
    %65 = arith.mulf %64, %44 : vector<32x32xf32>
    %66 = vector.extract_strided_slice %4 {offsets = [0, 7], sizes = [32, 1], strides = [1, 1]} : vector<32x8xf32> to vector<32x1xf32>
    %67 = vector.broadcast %66 : vector<32x1xf32> to vector<32x32xf32>
    %68 = arith.mulf %67, %44 : vector<32x32xf32>
    %69 = tpu.concatenate %47, %50, %53, %56, %59, %62, %65, %68 in 1 : vector<32x32xf32>, vector<32x32xf32>, vector<32x32xf32>, vector<32x32xf32>, vector<32x32xf32>, vector<32x32xf32>, vector<32x32xf32>, vector<32x32xf32> -> vector<32x256xf32>
    %c0_19 = arith.constant 0 : index
    %c0_20 = arith.constant 0 : index
    %70 = vector.load %arg8[%c0_19, %c0_20] : memref<256x32xf32, #tpu.memory_space<vmem>>, vector<256x32xf32>
    %cst_21 = arith.constant dense<0.000000e+00> : vector<32x32xf32>
    %71 = tpu.matmul %69, %70, %cst_21 {dimension_numbers = #tpu.dot_dimension_numbers<[1], [0], [0], [1], [0, 0, 1, 1], [], []>} : vector<32x256xf32>, vector<256x32xf32>, vector<32x32xf32> -> vector<32x32xf32>
    %c0_22 = arith.constant 0 : index
    %c0_23 = arith.constant 0 : index
    %72 = vector.load %arg9[%c0_22, %c0_23] : memref<8x32xf32, #tpu.memory_space<vmem>>, vector<8x32xf32>
    %cst_24 = arith.constant dense<0.000000e+00> : vector<32x32xf32>
    %73 = tpu.matmul %4, %72, %cst_24 {dimension_numbers = #tpu.dot_dimension_numbers<[1], [0], [0], [1], [0, 0, 1, 1], [], []>} : vector<32x8xf32>, vector<8x32xf32>, vector<32x32xf32> -> vector<32x32xf32>
    %74 = arith.addf %71, %73 : vector<32x32xf32>
    %cst_25 = arith.constant 0.000000e+00 : f32
    %75 = vector.broadcast %cst_25 : f32 to vector<32x32xf32>
    %76 = arith.cmpf oge, %74, %75 : vector<32x32xf32>
    %cst_26 = arith.constant 0.00999999977 : f32
    %77 = vector.broadcast %cst_26 : f32 to vector<32x32xf32>
    %78 = arith.mulf %77, %74 : vector<32x32xf32>
    %79 = arith.select %76, %74, %78 : vector<32x32xi1>, vector<32x32xf32>
    %c0_27 = arith.constant 0 : index
    %c0_28 = arith.constant 0 : index
    %80 = vector.load %arg10[%c0_27, %c0_28] : memref<32x4xf32, #tpu.memory_space<vmem>>, vector<32x4xf32>
    %cst_29 = arith.constant dense<0.000000e+00> : vector<32x4xf32>
    %81 = tpu.matmul %79, %80, %cst_29 {dimension_numbers = #tpu.dot_dimension_numbers<[1], [0], [0], [1], [0, 0, 1, 1], [], []>} : vector<32x32xf32>, vector<32x4xf32>, vector<32x4xf32> -> vector<32x4xf32>
    %c0_30 = arith.constant 0 : index
    %c0_31 = arith.constant 0 : index
    %82 = vector.load %arg11[%c0_30, %c0_31] : memref<1x4xf32, #tpu.memory_space<vmem>>, vector<1x4xf32>
    %83 = vector.broadcast %82 : vector<1x4xf32> to vector<32x4xf32>
    %84 = arith.addf %81, %83 : vector<32x4xf32>
    %c0_32 = arith.constant 0 : index
    %c0_33 = arith.constant 0 : index
    %c0_34 = arith.constant 0 : index
    %85 = vector.load %arg12[%c0_32, %c0_33, %c0_34] : memref<1x32x4xf32, #tpu.memory_space<vmem>>, vector<1x32x4xf32>
    %86 = vector.shape_cast %85 : vector<1x32x4xf32> to vector<32x4xf32>
    %87 = vector.shape_cast %84 : vector<32x4xf32> to vector<1x32x4xf32>
    tpu.vector_store %arg12[%c0_32, %c0_33, %c0_34], %87 {strides = array<i32>} : memref<1x32x4xf32, #tpu.memory_space<vmem>>, vector<1x32x4xf32>,
    return
  }
  func.func @transform_0(%arg0: i32) -> (i32, i32, i32) {
    %c0_i32 = arith.constant 0 : i32
    %c0_i32_0 = arith.constant 0 : i32
    %c0_i32_1 = arith.constant 0 : i32
    return %arg0, %c0_i32, %c0_i32_0 : i32, i32, i32
  }
  func.func @transform_1(%arg0: i32) -> (i32, i32, i32) {
    %c0_i32 = arith.constant 0 : i32
    %c0_i32_0 = arith.constant 0 : i32
    %c0_i32_1 = arith.constant 0 : i32
    return %arg0, %c0_i32, %c0_i32_0 : i32, i32, i32
  }
  func.func @transform_2(%arg0: i32) -> (i32, i32) {
    %c0_i32 = arith.constant 0 : i32
    %c0_i32_0 = arith.constant 0 : i32
    %c0_i32_1 = arith.constant 0 : i32
    return %c0_i32, %c0_i32_0 : i32, i32
  }
  func.func @transform_3(%arg0: i32) -> (i32, i32) {
    %c0_i32 = arith.constant 0 : i32
    %c0_i32_0 = arith.constant 0 : i32
    %c0_i32_1 = arith.constant 0 : i32
    return %c0_i32, %c0_i32_0 : i32, i32
  }
  func.func @transform_4(%arg0: i32) -> (i32, i32) {
    %c0_i32 = arith.constant 0 : i32
    %c0_i32_0 = arith.constant 0 : i32
    %c0_i32_1 = arith.constant 0 : i32
    return %c0_i32, %c0_i32_0 : i32, i32
  }
  func.func @transform_5(%arg0: i32) -> (i32, i32) {
    %c0_i32 = arith.constant 0 : i32
    %c0_i32_0 = arith.constant 0 : i32
    %c0_i32_1 = arith.constant 0 : i32
    return %c0_i32, %c0_i32_0 : i32, i32
  }
  func.func @transform_6(%arg0: i32) -> (i32, i32) {
    %c0_i32 = arith.constant 0 : i32
    %c0_i32_0 = arith.constant 0 : i32
    %c0_i32_1 = arith.constant 0 : i32
    return %c0_i32, %c0_i32_0 : i32, i32
  }
  func.func @transform_7(%arg0: i32) -> (i32, i32) {
    %c0_i32 = arith.constant 0 : i32
    %c0_i32_0 = arith.constant 0 : i32
    %c0_i32_1 = arith.constant 0 : i32
    return %c0_i32, %c0_i32_0 : i32, i32
  }
  func.func @transform_8(%arg0: i32) -> (i32, i32) {
    %c0_i32 = arith.constant 0 : i32
    %c0_i32_0 = arith.constant 0 : i32
    %c0_i32_1 = arith.constant 0 : i32
    return %c0_i32, %c0_i32_0 : i32, i32
  }
  func.func @transform_9(%arg0: i32) -> (i32, i32) {
    %c0_i32 = arith.constant 0 : i32
    %c0_i32_0 = arith.constant 0 : i32
    %c0_i32_1 = arith.constant 0 : i32
    return %c0_i32, %c0_i32_0 : i32, i32
  }
  func.func @transform_10(%arg0: i32) -> (i32, i32) {
    %c0_i32 = arith.constant 0 : i32
    %c0_i32_0 = arith.constant 0 : i32
    %c0_i32_1 = arith.constant 0 : i32
    return %c0_i32, %c0_i32_0 : i32, i32
  }
  func.func @transform_11(%arg0: i32) -> (i32, i32, i32) {
    %c0_i32 = arith.constant 0 : i32
    %c0_i32_0 = arith.constant 0 : i32
    %c0_i32_1 = arith.constant 0 : i32
    return %arg0, %c0_i32, %c0_i32_0 : i32, i32, i32
  }
}

</mosaic_0001>

<bundles_post_ra>
// kernel: tpu_custom_call.1
= control target key start
LH: loop header
LB: loop body
LE: loop exit
PB: predicated region body
PF: predicated region fallthrough
CT: control target
= control target key end

     0   :  { %s2253_s17 = smov 0   ;;  %s2890_s0 = inlined_call_operand.vmem [shape: f32[2,32,16], index: 0, kind: input, shape index: {}]   ;;  %s2891_s1 = inlined_call_operand.vmem [shape: f32[2,32,8], index: 1, kind: input, shape index: {}]   ;;  %s2892_s2 = inlined_call_operand.vmem [shape: f32[32,8], index: 2, kind: input, shape index: {}]   ;;  %s2893_s3 = inlined_call_operand.vmem [shape: f32[16,32], index: 3, kind: input, shape index: {}]   ;;  %s2894_s4 = inlined_call_operand.vmem [shape: f32[1,32], index: 4, kind: input, shape index: {}]   ;;  %s2895_s5 = inlined_call_operand.vmem [shape: f32[256,32], index: 5, kind: input, shape index: {}]   ;;  %s2896_s6 = inlined_call_operand.vmem [shape: f32[8,32], index: 6, kind: input, shape index: {}]   ;;  %s2897_s7 = inlined_call_operand.vmem [shape: f32[256,32], index: 7, kind: input, shape index: {}]   ;;  %s2898_s8 = inlined_call_operand.vmem [shape: f32[8,32], index: 8, kind: input, shape index: {}]   ;;  %s2899_s9 = inlined_call_operand.vmem [shape: f32[32,4], index: 9, kind: input, shape index: {}]   ;;  %s2900_s10 = inlined_call_operand.vmem [shape: f32[1,4], index: 10, kind: input, shape index: {}]   ;;  %s2901_s11 = inlined_call_operand.vmem [shape: f32[2,32,4], index: 11, kind: output, shape index: {}]  }
   0x1 LB: > { %s1724_s18 = sadd.s32 4294967295, %s2180_s17   ;;  %p1728_p0 = scmp.ge.s32.totalorder %s2180_s17, 1  ;;  %s2180_s17 = sphi %s2253_s17, %s21_s17  }
   0x2   : > { %p347_p1 = scmp.lt.s32.totalorder %s2180_s17, 3 }
   0x4   : > { %p348_p2 = pnand %p1728_p0, %p347_p1 }
   0x5   : > { %v419_v0 = vld [vmem:[%s2893_s3] sm:$0xff] (!%p348_p2)  ;;  %v420_v1 = vld [vmem:[%s2893_s3 + $0x8] sm:$0xff] (!%p348_p2)  ;;  %p392_p3 = scmp.lt.s32.totalorder (!%p348_p2), %s1724_s18, 1  ;;  %v2182_v4 = vmov (!%p348_p2), 6   ;;  %v2183_v5 = vmov (!%p348_p2), 5   ;;  %vm428_vm0 = vcmask (!%p348_p2), 130048  }
   0x6   : > { %351 = sbr.rel (%p348_p2) target bundleno = 1164 (0x48c), region = 64  ;;  %v2270_v2 = vld [vmem:[%s2892_s2] sm:$0xff] (!%p348_p2)  ;;  %v1910_v3 = vpack.c.bf16 (!%p348_p2), %v420_v1, %v419_v0  ;;  %2007 = vset.pattern.permute.xlu1 (!%p348_p2), %v2182_v4  ;;  %2005 = vset.pattern.permute.xlu0 (!%p348_p2), %v2183_v5  ;;  %v2184_v7 = vmov (!%p348_p2), 2   ;;  %v2185_v10 = vmov (!%p348_p2), 1   ;;  %v2186_v12 = vmov (!%p348_p2), 7   ;;  %v2294_v13 = vld [vmem:[%s2892_s2 + $0x8] sm:$0xff] (!%p348_p2) }
   0x7   : > { %651 = vperm.xlu1 (!%p348_p2), %2007, %v2270_v2   ;;  %631 = vperm.xlu0 (!%p348_p2), %2005, %v2270_v2   ;;  %v2302_v14 = vld [vmem:[%s2892_s2 + $0x10] sm:$0xff] (!%p348_p2)  ;;  %v2309_v15 = vld [vmem:[%s2892_s2 + $0x18] sm:$0xff] (!%p348_p2)  ;;  %v2187_v16 = vmov (!%p348_p2), 3   ;;  %v2188_v17 = vmov (!%p348_p2), 4   ;;  %v2189_v18 = vmov (!%p348_p2), 0   ;;  %v845_v20 = vld [vmem:[%s2896_s6] sm:$0xff] (!%p348_p2) }
   0x8   : > { %1911 = vmatprep.subr.bf16.mxu0 (!%p348_p2), %v1910_v3  ;;  %vm846_vm1 = vcmask (!%p348_p2), 64512   ;;  %v829_v21 = vld [vmem:[%s2895_s5 + $0x80] sm:$0xff] (!%p348_p2)  ;;  %v830_v22 = vld [vmem:[%s2895_s5 + $0x88] sm:$0xff] (!%p348_p2)  ;;  %1880 = vmatprep.subr.mxu1 (!%p348_p2), %v845_v20  ;;  %v831_v26 = vld [vmem:[%s2895_s5 + $0x90] sm:$0xff] (!%p348_p2)  ;;  %s2190_s29 = smov (!%p348_p2), 64   ;;  %s2191_s30 = smov (!%p348_p2), 32  }
   0x9   : > { %1913 = vmatpush3.bf16.msra.mxu0 (!%p348_p2), %v1910_v3  ;;  %1882 = vmatprep.mubr.msk.f32.mxu1 (!%p348_p2), %vm846_vm1, %v2270_v2  ;;  %v1914_v23 = vpack.c.bf16 (!%p348_p2), %v830_v22, %v829_v21  ;;  %v813_v24 = vld [vmem:[%s2895_s5] sm:$0xff] (!%p348_p2)  ;;  %v814_v25 = vld [vmem:[%s2895_s5 + $0x8] sm:$0xff] (!%p348_p2)  ;;  %v832_v28 = vld [vmem:[%s2895_s5 + $0x98] sm:$0xff] (!%p348_p2)  ;;  %s2192_s16 = smov (!%p348_p2), 96   ;;  %vm786_vm2 = vcmask (!%p348_p2), 261120   ;;  %vm791_vm3 = vcmask (!%p348_p2), 523264  }
   0xa   : > { %1881 = vmatpush3.msra.mxu1 (!%p348_p2), %v845_v20  ;;  %v1916_v27 = vpack.c.bf16 (!%p348_p2), %v814_v25, %v813_v24  ;;  %v815_v29 = vld [vmem:[%s2895_s5 + $0x10] sm:$0xff] (!%p348_p2)  ;;  %v816_v30 = vld [vmem:[%s2895_s5 + $0x18] sm:$0xff] (!%p348_p2)  ;;  %v1918_v31 = vpack.c.bf16 (!%p348_p2), %v832_v28, %v831_v26  ;;  %v833_v32 = vld [vmem:[%s2895_s5 + $0xa0] sm:$0xff] (!%p348_p2)  ;;  %vm796_vm4 = vcmask (!%p348_p2), 785408   ;;  %vm1652_vm13 = vcmask (!%p348_p2), 31744  }
   0xb   : > { %2008 = vset.pattern.permute.xlu1 (!%p348_p2), %v2184_v7  ;;  %2006 = vset.pattern.permute.xlu0 (!%p348_p2), %v2185_v10  ;;  %v834_v33 = vld [vmem:[%s2895_s5 + $0xa8] sm:$0xff] (!%p348_p2)  ;;  %v1920_v34 = vpack.c.bf16 (!%p348_p2), %v816_v30, %v815_v29  ;;  %v817_v36 = vld [vmem:[%s2895_s5 + $0x20] sm:$0xff] (!%p348_p2)  ;;  %v835_v38 = vld [vmem:[%s2895_s5 + $0xb0] sm:$0xff] (!%p348_p2) }
   0xc   : > { %571 = vperm.xlu1 (!%p348_p2), %2008, %v2270_v2   ;;  %551 = vperm.xlu0 (!%p348_p2), %2006, %v2270_v2   ;;  %v1922_v35 = vpack.c.bf16 (!%p348_p2), %v834_v33, %v833_v32  ;;  %v818_v37 = vld [vmem:[%s2895_s5 + $0x28] sm:$0xff] (!%p348_p2)  ;;  %v836_v39 = vld [vmem:[%s2895_s5 + $0xb8] sm:$0xff] (!%p348_p2)  ;;  %v819_v42 = vld [vmem:[%s2895_s5 + $0x30] sm:$0xff] (!%p348_p2) }
   0xd   : > { %s2903_s18 = smov (!%p392_p3, %s1724_s18), 1  ;;  %1883 = vmatmul.mubr.msk.f32.vlgmr.msra.gmra.mrb[0].mxu1 %vm846_vm1, %v2294_v13  ;;  %1915 = vmatprep.subr.bf16.mxu1 %v1914_v23  ;;  %v1924_v40 = vpack.c.bf16 %v818_v37, %v817_v36  ;;  %v1926_v41 = vpack.c.bf16 %v836_v39, %v835_v38  ;;  %v820_v43 = vld [vmem:[%s2895_s5 + $0x38] sm:$0xff]  ;;  %v837_v44 = vld [vmem:[%s2895_s5 + $0xc0] sm:$0xff]  ;;  %v838_v45 = vld [vmem:[%s2895_s5 + $0xc8] sm:$0xff] }
   0xe   : > { %s2275_s25 = sshll.u32 %s2903_s18, 5  ;;  %1917 = vmatpush3.bf16.msra.mxu1 %v1916_v27  ;;  %1885 = vmatprep.mubr.msk.f32.mxu1 %vm846_vm1, %v2302_v14  ;;  %v1928_v46 = vpack.c.bf16 %v820_v43, %v819_v42  ;;  %v1930_v47 = vpack.c.bf16 %v838_v45, %v837_v44  ;;  %v821_v48 = vld [vmem:[%s2895_s5 + $0x40] sm:$0xff]  ;;  %v822_v49 = vld [vmem:[%s2895_s5 + $0x48] sm:$0xff]  ;;  %v840_v3 = vld [vmem:[%s2895_s5 + $0xd8] sm:$0xff] }
   0xf   : > { %s396_s28 = scalar_lea.vmem %s2890_s0, %s2275_s25  ;;  %s2354_s19 = scalar_lea.vmem %s2891_s1, %s2275_s25  ;;  %1919 = vmatprep.subr.bf16.mxu1 %v1918_v31  ;;  %v1932_v50 = vpack.c.bf16 %v822_v49, %v821_v48  ;;  %v841_v22 = vld [vmem:[%s2895_s5 + $0xe0] sm:$0xff]  ;;  %v842_v23 = vld [vmem:[%s2895_s5 + $0xe8] sm:$0xff] }
  0x10   : > { %v407_v6 = vld [vmem:[%s396_s28] sm:$0xff]  ;;  %v408_v8 = vld [vmem:[%s396_s28 + $0x8] sm:$0xff]  ;;  %v409_v9 = vld [vmem:[%s396_s28 + $0x10] sm:$0xff]  ;;  %2009 = vset.pattern.permute.xlu1 %v2186_v12  ;;  %2012 = vset.pattern.permute.xlu0 %v2182_v4  ;;  %v1938_v25 = vpack.c.bf16 %v842_v23, %v841_v22  ;;  %s406_s15 = scalar_lea.vmem %s2901_s11, %s2275_s25 }
  0x11   : > { %1874 = vmatprep.mubr.msk.f32.mxu0 %vm428_vm0, %v407_v6  ;;  %v410_v11 = vld [vmem:[%s396_s28 + $0x18] sm:$0xff]  ;;  %671 = vperm.xlu1 %2009, %v2270_v2   ;;  %v2357_v19 = vld [vmem:[%s2354_s19] sm:$0xff]  ;;  %v826_v49 = vld [vmem:[%s2895_s5 + $0x68] sm:$0xff] }
  0x12   : > { %1875 = vmatmul.mubr.msk.f32.vlgmr.msra.gmra.mrb[0].mxu0 %vm428_vm0, %v408_v8  ;;  %655 = vperm.xlu0 %2012, %v2294_v13   ;;  %v824_v8 = vld [vmem:[%s2895_s5 + $0x58] sm:$0xff]  ;;  %v825_v48 = vld [vmem:[%s2895_s5 + $0x60] sm:$0xff] }
  0x13   : > { %1877 = vmatprep.mubr.msk.f32.mxu0 %vm428_vm0, %v409_v9  ;;  %1886 = vmatmul.mubr.msk.f32.gmra.mrb[2].mxu1 %vm846_vm1, %v2309_v15 }
  0x14   : > { %1921 = vmatpush3.bf16.msra.mxu1 %v1920_v34 }
  0x15   : > { %2010 = vset.pattern.permute.xlu1 %v2183_v5  ;;  %1923 = vmatprep.subr.bf16.mxu1 %v1922_v35 }
  0x16   : > { %1878 = vmatmul.mubr.msk.f32.gmra.mrb[2].mxu0 %vm428_vm0, %v410_v11  ;;  %635 = vperm.xlu1 %2010, %v2294_v13  }
  0x17   : > { %659 = vperm.xlu0 %2012, %v2302_v14   ;;  %1890 = vmatprep.mubr.msk.f32.mxu0 %vm846_vm1, %v2357_v19 }
  0x18   : > { %1925 = vmatpush3.bf16.msra.mxu1 %v1924_v40 }
  0x19   : > { %1927 = vmatprep.subr.bf16.mxu1 %v1926_v41 }
  0x1a   : > { %2011 = vset.pattern.permute.xlu1 %v2185_v10 }
  0x1b   : > { %555 = vperm.xlu1 %2011, %v2294_v13   ;;  %663 = vperm.xlu0 %2012, %v2309_v15  }
  0x1c   : > { %1929 = vmatpush3.bf16.msra.mxu1 %v1928_v46 }
  0x1d   : > { %1931 = vmatprep.subr.bf16.mxu1 %v1930_v47 }
  0x1f   : > { %2013 = vset.pattern.permute.xlu1 %v2184_v7  ;;  %2021 = vset.pattern.permute.xlu0 %v2187_v16 }
  0x20   : > { %575 = vperm.xlu1 %2013, %v2294_v13   ;;  %591 = vperm.xlu0 %2021, %v2270_v2  }
  0x21   : > { %1933 = vmatpush3.bf16.msra.mxu1 %v1932_v50  ;;  %v843_v50 = vld [vmem:[%s2895_s5 + $0xf0] sm:$0xff] }
  0x24   : > { %2014 = vset.pattern.permute.xlu1 %v2186_v12  ;;  %595 = vperm.xlu0 %2021, %v2294_v13  }
  0x25   : > { %675 = vperm.xlu1 %2014, %v2294_v13  }
  0x28   : > { %599 = vperm.xlu0 %2021, %v2302_v14  }
  0x29   : > { %2015 = vset.pattern.permute.xlu1 %v2183_v5 }
  0x2a   : > { %639 = vperm.xlu1 %2015, %v2302_v14  }
  0x2c   : > { %603 = vperm.xlu0 %2021, %v2309_v15  }
  0x2e   : > { %2016 = vset.pattern.permute.xlu1 %v2185_v10 }
  0x2f   : > { %559 = vperm.xlu1 %2016, %v2302_v14  }
  0x30   : > { %2026 = vset.pattern.permute.xlu0 %v2188_v17 }
  0x31   : > { %615 = vperm.xlu0 %2026, %v2294_v13  }
  0x33   : > { %2017 = vset.pattern.permute.xlu1 %v2184_v7 }
  0x34   : > { %579 = vperm.xlu1 %2017, %v2302_v14  }
  0x35   : > { %2028 = vset.pattern.permute.xlu0 %v2189_v18 }
  0x36   : > { %538 = vperm.xlu0 %2028, %v2302_v14  }
  0x38   : > { %2018 = vset.pattern.permute.xlu1 %v2186_v12 }
  0x39   : > { %679 = vperm.xlu1 %2018, %v2302_v14  }
  0x3a   : > { %543 = vperm.xlu0 %2028, %v2309_v15  }
  0x3d   : > { %2019 = vset.pattern.permute.xlu1 %v2183_v5 }
  0x3e   : > { %643 = vperm.xlu1 %2019, %v2309_v15   ;;  %2089 = vset.pattern.permute.xlu0 %v2183_v5  ;;  %v823_v5 = vld [vmem:[%s2895_s5 + $0x50] sm:$0xff] }
  0x3f   : > { %v1936_v9 = vpack.c.bf16 %v824_v8, %v823_v5 }
  0x42   : > { %2020 = vset.pattern.permute.xlu1 %v2185_v10 }
  0x43   : > { %563 = vperm.xlu1 %2020, %v2309_v15  }
  0x47   : > { %2022 = vset.pattern.permute.xlu1 %v2184_v7 }
  0x48   : > { %583 = vperm.xlu1 %2022, %v2309_v15  }
  0x4c   : > { %2023 = vset.pattern.permute.xlu1 %v2186_v12 }
  0x4d   : > { %683 = vperm.xlu1 %2023, %v2309_v15  }
  0x51   : > { %2024 = vset.pattern.permute.xlu1 %v2188_v17 }
  0x52   : > { %611 = vperm.xlu1 %2024, %v2270_v2  }
  0x56   : > { %2025 = vset.pattern.permute.xlu1 %v2189_v18 }
  0x57   : > { %528 = vperm.xlu1 %2025, %v2270_v2   ;;  %v839_v2 = vld [vmem:[%s2895_s5 + $0xd0] sm:$0xff] }
  0x58   : > { %v1934_v6 = vpack.c.bf16 %v840_v3, %v839_v2 }
  0x5a   : > { %1935 = vmatprep.subr.bf16.mxu1 %v1934_v6 }
  0x5b   : > { %533 = vperm.xlu1 %2025, %v2294_v13   ;;  %v1735_v13 = vld [vmem:[%s2894_s4] ss:$0 sm:$0xff]  ;;  %1937 = vmatpush3.bf16.msra.mxu1 %v1936_v9 }
  0x5c   : > { %1939 = vmatprep.subr.bf16.mxu1 %v1938_v25 }
  0x5f   : > { %2027 = vset.pattern.permute.xlu1 %v2188_v17 }
  0x60   : > { %619 = vperm.xlu1 %2027, %v2302_v14  }
  0x64   : > { %623 = vperm.xlu1 %2027, %v2309_v15  }
  0x68   : > { %2090 = vset.pattern.permute.xlu1 %v2185_v10 }
  0x86   : > { %v652_v51 = vpop.permute.xlu1 %651  ;;  %v632_v57 = vpop.permute.xlu0 %631 }
  0x8b   : > { %v572_v52 = vpop.permute.xlu1 %571  ;;  %v552_v59 = vpop.permute.xlu0 %551 }
  0x90   : > { %v672_v53 = vpop.permute.xlu1 %671 }
  0x91   : > { %v656_v61 = vpop.permute.xlu0 %655 }
  0x95   : > { %v636_v54 = vpop.permute.xlu1 %635 }
  0x96   : > { %v2434_v63 = vpop.permute.xlu0 %659 }
  0x9a   : > { %v556_v55 = vpop.permute.xlu1 %555  ;;  %v2438_v1 = vpop.permute.xlu0 %663 }
  0x9f   : > { %v576_v56 = vpop.permute.xlu1 %575  ;;  %v592_v14 = vpop.permute.xlu0 %591 }
  0xa3   : > { %v596_v36 = vpop.permute.xlu0 %595 }
  0xa4   : > { %v2432_v58 = vpop.permute.xlu1 %675 }
  0xa9   : > { %v640_v60 = vpop.permute.xlu1 %639 }
  0xae   : > { %v560_v62 = vpop.permute.xlu1 %559 }
  0xb3   : > { %v2436_v0 = vpop.permute.xlu1 %579 }
  0xb8   : > { %v680_v11 = vpop.permute.xlu1 %679 }
  0xbd   : > { %v644_v28 = vpop.permute.xlu1 %643 }
  0xc2   : > { %v564_v44 = vpop.permute.xlu1 %563 }
  0xc7   : > { %v584_v6 = vpop.permute.xlu1 %583 }
  0xe5   : > { %v1876_v15 = vpop.f32.mrb[0].mxu0 }
  0xe6   : > { %v2455_v20 = vadd.f32 %v1876_v15, %v1735_v13  ;;  %v507_v21 = vpop.f32.mrb[1].mxu0 }
  0xe7   : > { %v2463_v24 = vadd.f32 %v1735_v13, %v507_v21 }
  0xe8   : > { %v587_v26 = vmul.f32 %v576_v56, %v2455_v20  ;;  %v667_v27 = vmul.f32 %v656_v61, %v2455_v20  ;;  %v567_v30 = vmul.f32 %v556_v55, %v2455_v20  ;;  %v647_v31 = vmul.f32 %v636_v54, %v2455_v20  ;;  %v827_v54 = vld [vmem:[%s2895_s5 + $0x70] sm:$0xff]  ;;  %v828_v55 = vld [vmem:[%s2895_s5 + $0x78] sm:$0xff] }
  0xe9   : > { %v1879_v29 = vpop.f32.mrb[2].mxu0  ;;  %v606_v34 = vmul.f32 %v592_v14, %v2463_v24  ;;  %v686_v35 = vmul.f32 %v672_v53, %v2463_v24  ;;  %v566_v39 = vmul.f32 %v552_v59, %v2463_v24  ;;  %v646_v40 = vmul.f32 %v632_v57, %v2463_v24 }
  0xea   : > { %v517_v32 = vpop.f32.mrb[3].mxu0  ;;  %v2034_v33 = vpack.i.bf16 %v587_v26, %v667_v27  ;;  %v2029_v38 = vpack.i.bf16 %v567_v30, %v647_v31  ;;  %v586_v46 = vmul.f32 %v572_v52, %v2463_v24  ;;  %v666_v47 = vmul.f32 %v652_v51, %v2463_v24  ;;  %v844_v52 = vld [vmem:[%s2895_s5 + $0xf8] sm:$0xff]  ;;  %v600_v51 = vpop.permute.xlu0 %599  ;;  %v2528_v27 = vld [vmem:[%s2354_s19 + $0x8] sm:$0xff] }
  0xeb   : > { %v2471_v37 = vadd.f32 %v1735_v13, %v517_v32  ;;  %v2054_v41 = vpack.i.bf16 %v606_v34, %v686_v35  ;;  %v2039_v45 = vpack.i.bf16 %v566_v39, %v646_v40  ;;  %v2494_v53 = vadd.f32 %v1879_v29, %v1735_v13  ;;  %v2538_v30 = vld [vmem:[%s2354_s19 + $0x18] sm:$0xff] }
  0xec   : > { %2035 = vrot.lane.b32.xlu0 %v2034_v33, %s2190_s29  ;;  %2030 = vrot.lane.b32.xlu1 %v2029_v38, %s2191_s30  ;;  %v2044_v61 = vpack.i.bf16 %v586_v46, %v666_v47  ;;  %v687_v2 = vmul.f32 %v2432_v58, %v2455_v20  ;;  %v1942_v3 = vpack.c.bf16 %v844_v52, %v843_v50 }
  0xed   : > { %v568_v42 = vmul.f32 %v560_v62, %v2471_v37  ;;  %v648_v43 = vmul.f32 %v640_v60, %v2471_v37  ;;  %v608_v57 = vmul.f32 %v600_v51, %v2471_v37  ;;  %v688_v59 = vmul.f32 %v680_v11, %v2471_v37 }
  0xee   : > { %v1940_v60 = vpack.c.bf16 %v826_v49, %v825_v48  ;;  %v607_v62 = vmul.f32 %v596_v36, %v2455_v20  ;;  %v1944_v5 = vpack.c.bf16 %v828_v55, %v827_v54  ;;  %v589_v9 = vmul.f32 %v584_v6, %v2494_v53  ;;  %v2588_v36 = vpop.f32.mrb[0].mxu1 }
  0xef   : > { %v2059_v56 = vpack.i.bf16 %v568_v42, %v648_v43  ;;  %v2074_v8 = vpack.i.bf16 %v608_v57, %v688_v59  ;;  %v669_v11 = vmul.f32 %v2438_v1, %v2494_v53  ;;  %v588_v14 = vmul.f32 %v2436_v0, %v2471_v37  ;;  %v684_v0 = vpop.permute.xlu1 %683 }
  0xf0   : > { %2055 = vrot.lane.b32.xlu0 %v2054_v41, %s2192_s16  ;;  %2040 = vrot.lane.b32.xlu1 %v2039_v45, %s2191_s30  ;;  %v2049_v13 = vpack.i.bf16 %v607_v62, %v687_v2  ;;  %v668_v58 = vmul.f32 %v2434_v63, %v2471_v37  ;;  %v569_v22 = vmul.f32 %v564_v44, %v2494_v53  ;;  %v604_v63 = vpop.permute.xlu0 %603 }
  0xf1   : > { %1941 = vmatpush3.bf16.msra.mxu1 %v1940_v60  ;;  %v2079_v15 = vpack.i.bf16 %v589_v9, %v669_v11  ;;  %v649_v1 = vmul.f32 %v644_v28, %v2494_v53  ;;  %v609_v25 = vmul.f32 %v604_v63, %v2494_v53  ;;  %v689_v26 = vmul.f32 %v684_v0, %v2494_v53  ;;  %v2533_v28 = vld [vmem:[%s2354_s19 + $0x10] sm:$0xff] }
  0xf2   : > { %1943 = vmatprep.subr.bf16.mxu1 %v1942_v3  ;;  %v2064_v21 = vpack.i.bf16 %v588_v14, %v668_v58 }
  0xf3   : > { %v2069_v23 = vpack.i.bf16 %v569_v22, %v649_v1  ;;  %v2084_v29 = vpack.i.bf16 %v609_v25, %v689_v26 }
  0xf4   : > { %2060 = vrot.lane.b32.xlu0 %v2059_v56, %s2191_s30  ;;  %2045 = vrot.lane.b32.xlu1 %v2044_v61, %s2190_s29  ;;  %v616_v32 = vpop.permute.xlu0 %615 }
  0xf5   : > { %1945 = vmatpush3.bf16.msra.mxu1 %v1944_v5  ;;  %v627_v45 = vmul.f32 %v616_v32, %v2455_v20 }
  0xf8   : > { %2075 = vrot.lane.b32.xlu0 %v2074_v8, %s2192_s16  ;;  %2050 = vrot.lane.b32.xlu1 %v2049_v13, %s2192_s16  ;;  %v539_v34 = vpop.permute.xlu0 %538 }
  0xfc   : > { %2080 = vrot.lane.b32.xlu0 %v2079_v15, %s2190_s29  ;;  %2065 = vrot.lane.b32.xlu1 %v2064_v21, %s2190_s29  ;;  %v548_v21 = vmul.f32 %v539_v34, %v2471_v37 }
 0x100   : > { %1142 = vperm.xlu0 %2089, %v2357_v19   ;;  %2070 = vrot.lane.b32.xlu1 %v2069_v23, %s2191_s30 }
 0x104   : > { %1146 = vperm.xlu0 %2089, %v2528_v27   ;;  %2085 = vrot.lane.b32.xlu1 %v2084_v29, %s2192_s16 }
 0x108   : > { %1150 = vperm.xlu0 %2089, %v2533_v28   ;;  %1062 = vperm.xlu1 %2090, %v2357_v19  }
 0x10c   : > { %1154 = vperm.xlu0 %2089, %v2538_v30   ;;  %2091 = vset.pattern.permute.xlu1 %v2182_v4 }
 0x10d   : > { %1162 = vperm.xlu1 %2091, %v2357_v19  }
 0x110   : > { %2102 = vset.pattern.permute.xlu0 %v2184_v7  ;;  %v612_v7 = vpop.permute.xlu1 %611 }
 0x111   : > { %1082 = vperm.xlu0 %2102, %v2357_v19   ;;  %2092 = vset.pattern.permute.xlu1 %v2186_v12  ;;  %v626_v48 = vmul.f32 %v612_v7, %v2463_v24 }
 0x112   : > { %1182 = vperm.xlu1 %2092, %v2357_v19  }
 0x114   : > { %v529_v31 = vpop.permute.xlu1 %528 }
 0x115   : > { %1086 = vperm.xlu0 %2102, %v2528_v27   ;;  %v546_v46 = vmul.f32 %v529_v31, %v2463_v24 }
 0x116   : > { %2093 = vset.pattern.permute.xlu1 %v2187_v16 }
 0x117   : > { %1102 = vperm.xlu1 %2093, %v2357_v19  }
 0x118   : > { %v534_v33 = vpop.permute.xlu1 %533 }
 0x119   : > { %1090 = vperm.xlu0 %2102, %v2533_v28   ;;  %v547_v59 = vmul.f32 %v534_v33, %v2455_v20 }
 0x11b   : > { %2094 = vset.pattern.permute.xlu1 %v2185_v10 }
 0x11c   : > { %1066 = vperm.xlu1 %2094, %v2528_v27  }
 0x11d   : > { %1094 = vperm.xlu0 %2102, %v2538_v30  }
 0x120   : > { %2095 = vset.pattern.permute.xlu1 %v2182_v4 }
 0x121   : > { %2107 = vset.pattern.permute.xlu0 %v2188_v17  ;;  %1166 = vperm.xlu1 %2095, %v2528_v27  }
 0x122   : > { %1122 = vperm.xlu0 %2107, %v2357_v19  }
 0x125   : > { %2096 = vset.pattern.permute.xlu1 %v2186_v12 }
 0x126   : > { %2110 = vset.pattern.permute.xlu0 %v2189_v18  ;;  %1186 = vperm.xlu1 %2096, %v2528_v27  }
 0x127   : > { %1044 = vperm.xlu0 %2110, %v2528_v27  }
 0x12a   : > { %2097 = vset.pattern.permute.xlu1 %v2187_v16 }
 0x12b   : > { %1054 = vperm.xlu0 %2110, %v2538_v30   ;;  %1106 = vperm.xlu1 %2097, %v2528_v27  }
 0x12f   : > { %2173 = vset.pattern.permute.xlu0 %v2186_v12  ;;  %2098 = vset.pattern.permute.xlu1 %v2185_v10 }
 0x130   : > { %1070 = vperm.xlu1 %2098, %v2533_v28  }
 0x134   : > { %2099 = vset.pattern.permute.xlu1 %v2182_v4 }
 0x135   : > { %1170 = vperm.xlu1 %2099, %v2533_v28  }
 0x139   : > { %2100 = vset.pattern.permute.xlu1 %v2186_v12 }
 0x13a   : > { %1190 = vperm.xlu1 %2100, %v2533_v28  }
 0x13e   : > { %2101 = vset.pattern.permute.xlu1 %v2187_v16 }
 0x13f   : > { %1110 = vperm.xlu1 %2101, %v2533_v28  }
 0x143   : > { %2103 = vset.pattern.permute.xlu1 %v2185_v10  ;;  %v620_v10 = vpop.permute.xlu1 %619 }
 0x144   : > { %1074 = vperm.xlu1 %2103, %v2538_v30   ;;  %v628_v15 = vmul.f32 %v620_v10, %v2471_v37 }
 0x147   : > { %v2586_v35 = vpop.permute.xlu1 %623 }
 0x148   : > { %2104 = vset.pattern.permute.xlu1 %v2182_v4  ;;  %v2584_v4 = vpop.permute.xlu0 %543  ;;  %v629_v34 = vmul.f32 %v2586_v35, %v2494_v53 }
 0x149   : > { %1174 = vperm.xlu1 %2104, %v2538_v30   ;;  %v549_v10 = vmul.f32 %v2584_v4, %v2494_v53 }
 0x14d   : > { %2105 = vset.pattern.permute.xlu1 %v2186_v12  ;;  %v2590_v12 = vpop.f32.mrb[1].mxu1 }
 0x14e   : > { %1194 = vperm.xlu1 %2105, %v2538_v30   ;;  %v2594_v39 = vpop.f32.mrb[2].mxu1 }
 0x14f   : > { %v2596_v40 = vpop.f32.mrb[3].mxu1 }
 0x152   : > { %2106 = vset.pattern.permute.xlu1 %v2187_v16 }
 0x153   : > { %1114 = vperm.xlu1 %2106, %v2538_v30  }
 0x157   : > { %2108 = vset.pattern.permute.xlu1 %v2189_v18 }
 0x158   : > { %1039 = vperm.xlu1 %2108, %v2357_v19  }
 0x15c   : > { %2109 = vset.pattern.permute.xlu1 %v2188_v17 }
 0x15d   : > { %1126 = vperm.xlu1 %2109, %v2528_v27  }
 0x15e   : > { %v2036_v38 = vpop.permute.xlu0 %2035  ;;  %v2031_v16 = vpop.permute.xlu1 %2030 }
 0x15f   : > { %v2032_v44 = vunpack.i.l.bf16 %v2031_v16  ;;  %v2037_v49 = vunpack.i.l.bf16 %v2036_v38  ;;  %v2033_v50 = vunpack.i.h.bf16 %v2031_v16  ;;  %v2038_v62 = vunpack.i.h.bf16 %v2036_v38 }
 0x161   : > { %1130 = vperm.xlu1 %2109, %v2533_v28   ;;  %v802_v61 = vsel %vm786_vm2, %v627_v45, %v2032_v44  ;;  %v788_v9 = vsel %vm786_vm2, %v547_v59, %v2033_v50  ;;  %v1337_v50 = vld [vmem:[%s2897_s7 + $0x80] sm:$0xff]  ;;  %v1323_v59 = vld [vmem:[%s2897_s7 + $0x10] sm:$0xff] }
 0x162   : > { %v2056_v41 = vpop.permute.xlu0 %2055  ;;  %v2041_v19 = vpop.permute.xlu1 %2040  ;;  %v806_v13 = vsel %vm791_vm3, %v802_v61, %v2037_v49  ;;  %v793_v22 = vsel %vm791_vm3, %v788_v9, %v2038_v62  ;;  %v1353_v49 = vld [vmem:[%s2898_s8] sm:$0xff]  ;;  %v1342_v62 = vld [vmem:[%s2897_s7 + $0xa8] sm:$0xff] }
 0x163   : > { %v2043_v42 = vunpack.i.h.bf16 %v2041_v19  ;;  %v2042_v43 = vunpack.i.l.bf16 %v2041_v19  ;;  %v2058_v55 = vunpack.i.h.bf16 %v2056_v41  ;;  %v2057_v56 = vunpack.i.l.bf16 %v2056_v41  ;;  %1888 = vmatprep.subr.mxu0 %v1353_v49  ;;  %v1341_v61 = vld [vmem:[%s2897_s7 + $0xa0] sm:$0xff] }
 0x164   : > { %1889 = vmatpush3.msra.mxu0 %v1353_v49  ;;  %v1333_v49 = vld [vmem:[%s2897_s7 + $0x60] sm:$0xff] }
 0x165   : > { %2111 = vset.pattern.permute.xlu1 %v2189_v18  ;;  %v787_v57 = vsel %vm786_vm2, %v546_v46, %v2043_v42  ;;  %v801_v18 = vsel %vm786_vm2, %v626_v48, %v2042_v43  ;;  %1891 = vmatmul.mubr.msk.f32.vlgmr.msra.gmra.mrb[4].mxu0 %vm846_vm1, %v2528_v27  ;;  %v1325_v27 = vld [vmem:[%s2897_s7 + $0x20] sm:$0xff] }
 0x166   : > { %v2046_v47 = vpop.permute.xlu1 %2045  ;;  %1049 = vperm.xlu1 %2111, %v2533_v28   ;;  %v2061_v52 = vpop.permute.xlu0 %2060  ;;  %1893 = vmatprep.mubr.msk.f32.mxu0 %vm846_vm1, %v2533_v28 }
 0x167   : > { %v2048_v51 = vunpack.i.h.bf16 %v2046_v47  ;;  %v2047_v54 = vunpack.i.l.bf16 %v2046_v47  ;;  %v2063_v20 = vunpack.i.h.bf16 %v2061_v52  ;;  %v2062_v11 = vunpack.i.l.bf16 %v2061_v52  ;;  %v1338_v52 = vld [vmem:[%s2897_s7 + $0x88] sm:$0xff] }
 0x169   : > { %v792_v60 = vsel %vm791_vm3, %v787_v57, %v2048_v51  ;;  %v805_v24 = vsel %vm791_vm3, %v801_v18, %v2047_v54  ;;  %v803_v26 = vsel %vm786_vm2, %v628_v15, %v2062_v11  ;;  %v789_v29 = vsel %vm786_vm2, %v548_v21, %v2063_v20  ;;  %v1321_v54 = vld [vmem:[%s2897_s7] sm:$0xff]  ;;  %v1340_v18 = vld [vmem:[%s2897_s7 + $0x98] sm:$0xff]  ;;  %1894 = vmatmul.mubr.msk.f32.gmra.mrb[6].mxu0 %vm846_vm1, %v2538_v30  ;;  %v1327_v20 = vld [vmem:[%s2897_s7 + $0x30] sm:$0xff] }
 0x16a   : > { %v2051_v2 = vpop.permute.xlu1 %2050  ;;  %v809_v3 = vsel %vm796_vm4, %v805_v24, %v2057_v56  ;;  %v797_v5 = vsel %vm796_vm4, %v792_v60, %v2058_v55  ;;  %2112 = vset.pattern.permute.xlu1 %v2188_v17  ;;  %v2076_v14 = vpop.permute.xlu0 %2075  ;;  %v1946_v51 = vpack.c.bf16 %v1338_v52, %v1337_v50  ;;  %v1322_v55 = vld [vmem:[%s2897_s7 + $0x8] sm:$0xff]  ;;  %v1339_v56 = vld [vmem:[%s2897_s7 + $0x90] sm:$0xff]  ;;  %v1324_v60 = vld [vmem:[%s2897_s7 + $0x18] sm:$0xff] }
 0x16b   : > { %v2053_v6 = vunpack.i.h.bf16 %v2051_v2  ;;  %v2052_v8 = vunpack.i.l.bf16 %v2051_v2  ;;  %1004 = vmatprep.mubr.f32.mxu1 %v809_v3  ;;  %1134 = vperm.xlu1 %2112, %v2538_v30   ;;  %v2078_v23 = vunpack.i.h.bf16 %v2076_v14  ;;  %v2077_v25 = vunpack.i.l.bf16 %v2076_v14  ;;  %v1328_v11 = vld [vmem:[%s2897_s7 + $0x38] sm:$0xff]  ;;  %v1346_v30 = vld [vmem:[%s2897_s7 + $0xc8] sm:$0xff]  ;;  %v1329_v15 = vld [vmem:[%s2897_s7 + $0x40] sm:$0xff] }
 0x16c   : > { %1005 = vmatmul.mubr.f32.vlgmr.msra.gmra.mrb[4].mxu1 %v797_v5  ;;  %v1948_v57 = vpack.c.bf16 %v1322_v55, %v1321_v54  ;;  %1947 = vmatprep.subr.bf16.mxu0 %v1946_v51  ;;  %v1950_v24 = vpack.c.bf16 %v1340_v18, %v1339_v56  ;;  %v1952_v2 = vpack.c.bf16 %v1324_v60, %v1323_v59  ;;  %v1326_v5 = vld [vmem:[%s2897_s7 + $0x28] sm:$0xff]  ;;  %v1351_v56 = vld [vmem:[%s2897_s7 + $0xf0] sm:$0xff] }
 0x16d   : > { %v810_v58 = vsel %vm796_vm4, %v806_v13, %v2052_v8  ;;  %v798_v63 = vsel %vm796_vm4, %v793_v22, %v2053_v6  ;;  %v1954_v3 = vpack.c.bf16 %v1342_v62, %v1341_v61  ;;  %v1343_v6 = vld [vmem:[%s2897_s7 + $0xb0] sm:$0xff]  ;;  %v1344_v8 = vld [vmem:[%s2897_s7 + $0xb8] sm:$0xff]  ;;  %v1956_v28 = vpack.c.bf16 %v1326_v5, %v1325_v27  ;;  %v1345_v13 = vld [vmem:[%s2897_s7 + $0xc0] sm:$0xff] }
 0x16e   : > { %v2066_v17 = vpop.permute.xlu1 %2065  ;;  %1009 = vmatprep.mubr.f32.mxu1 %v810_v58  ;;  %v2081_v38 = vpop.permute.xlu0 %2080  ;;  %1949 = vmatpush3.bf16.msra.mxu0 %v1948_v57  ;;  %v1958_v9 = vpack.c.bf16 %v1344_v8, %v1343_v6  ;;  %v1960_v14 = vpack.c.bf16 %v1328_v11, %v1327_v20  ;;  %v1962_v58 = vpack.c.bf16 %v1346_v30, %v1345_v13  ;;  %v1330_v21 = vld [vmem:[%s2897_s7 + $0x48] sm:$0xff]  ;;  %v1348_v22 = vld [vmem:[%s2897_s7 + $0xd8] sm:$0xff]  ;;  %v1335_v18 = vld [vmem:[%s2897_s7 + $0x70] sm:$0xff] }
 0x16f   : > { %v2068_v1 = vunpack.i.h.bf16 %v2066_v17  ;;  %v2067_v0 = vunpack.i.l.bf16 %v2066_v17  ;;  %v2083_v43 = vunpack.i.h.bf16 %v2081_v38  ;;  %v2082_v44 = vunpack.i.l.bf16 %v2081_v38  ;;  %1951 = vmatprep.subr.bf16.mxu0 %v1950_v24  ;;  %v1347_v17 = vld [vmem:[%s2897_s7 + $0xd0] sm:$0xff]  ;;  %v1334_v51 = vld [vmem:[%s2897_s7 + $0x68] sm:$0xff]  ;;  %v1352_v57 = vld [vmem:[%s2897_s7 + $0xf8] sm:$0xff] }
 0x170   : > { %1010 = vmatmul.mubr.f32.gmra.mrb[6].mxu1 %v798_v63  ;;  %v1331_v63 = vld [vmem:[%s2897_s7 + $0x50] sm:$0xff]  ;;  %v1972_v55 = vpack.c.bf16 %v1334_v51, %v1333_v49  ;;  %v1974_v60 = vpack.c.bf16 %v1352_v57, %v1351_v56  ;;  %v1336_v24 = vld [vmem:[%s2897_s7 + $0x78] sm:$0xff] }
 0x171   : > { %v807_v7 = vsel %vm791_vm3, %v803_v26, %v2067_v0  ;;  %v794_v31 = vsel %vm791_vm3, %v789_v29, %v2068_v1  ;;  %v1964_v1 = vpack.c.bf16 %v1330_v21, %v1329_v15  ;;  %v1966_v0 = vpack.c.bf16 %v1348_v22, %v1347_v17 }
 0x172   : > { %v2071_v37 = vpop.permute.xlu1 %2070  ;;  %v811_v32 = vsel %vm796_vm4, %v807_v7, %v2077_v25  ;;  %v799_v33 = vsel %vm796_vm4, %v794_v31, %v2078_v23  ;;  %1953 = vmatpush3.bf16.msra.mxu0 %v1952_v2  ;;  %v1332_v23 = vld [vmem:[%s2897_s7 + $0x58] sm:$0xff] }
 0x173   : > { %v2073_v16 = vunpack.i.h.bf16 %v2071_v37  ;;  %v2072_v41 = vunpack.i.l.bf16 %v2071_v37  ;;  %1014 = vmatprep.mubr.f32.mxu1 %v811_v32  ;;  %1955 = vmatprep.subr.bf16.mxu0 %v1954_v3  ;;  %v1968_v25 = vpack.c.bf16 %v1332_v23, %v1331_v63  ;;  %v1976_v3 = vpack.c.bf16 %v1336_v24, %v1335_v18 }
 0x174   : > { %1015 = vmatmul.mubr.f32.gmra.mrb[8].mxu1 %v799_v33 }
 0x175   : > { %v804_v19 = vsel %vm786_vm2, %v629_v34, %v2072_v41  ;;  %v790_v42 = vsel %vm786_vm2, %v549_v10, %v2073_v16 }
 0x176   : > { %v2086_v45 = vpop.permute.xlu1 %2085  ;;  %v808_v48 = vsel %vm791_vm3, %v804_v19, %v2082_v44  ;;  %v795_v35 = vsel %vm791_vm3, %v790_v42, %v2083_v43  ;;  %1957 = vmatpush3.bf16.msra.mxu0 %v1956_v28 }
 0x177   : > { %v2088_v46 = vunpack.i.h.bf16 %v2086_v45  ;;  %v2087_v47 = vunpack.i.l.bf16 %v2086_v45  ;;  %1959 = vmatprep.subr.bf16.mxu0 %v1958_v9 }
 0x179   : > { %v812_v53 = vsel %vm796_vm4, %v808_v48, %v2087_v47  ;;  %v800_v4 = vsel %vm796_vm4, %v795_v35, %v2088_v46 }
 0x17a   : > { %1019 = vmatprep.mubr.f32.mxu1 %v812_v53  ;;  %1961 = vmatpush3.bf16.msra.mxu0 %v1960_v14  ;;  %v1349_v53 = vld [vmem:[%s2897_s7 + $0xe0] sm:$0xff] }
 0x17b   : > { %1020 = vmatmul.mubr.f32.gmra.mrb[10].mxu1 %v800_v4  ;;  %1963 = vmatprep.subr.bf16.mxu0 %v1962_v58  ;;  %v1350_v4 = vld [vmem:[%s2897_s7 + $0xe8] sm:$0xff] }
 0x17c   : > { %v1970_v52 = vpack.c.bf16 %v1350_v4, %v1349_v53 }
 0x17e   : > { %1965 = vmatpush3.bf16.msra.mxu0 %v1964_v1 }
 0x17f   : > { %1967 = vmatprep.subr.bf16.mxu0 %v1966_v0  ;;  %v1143_v10 = vpop.permute.xlu0 %1142 }
 0x182   : > { %1969 = vmatpush3.bf16.msra.mxu0 %v1968_v25 }
 0x183   : > { %v1147_v16 = vpop.permute.xlu0 %1146  ;;  %1971 = vmatprep.subr.bf16.mxu0 %v1970_v52 }
 0x186   : > { %1973 = vmatpush3.bf16.msra.mxu0 %v1972_v55 }
 0x187   : > { %v1063_v26 = vpop.permute.xlu1 %1062  ;;  %v2726_v19 = vpop.permute.xlu0 %1150  ;;  %1975 = vmatprep.subr.bf16.mxu0 %v1974_v60 }
 0x18a   : > { %1977 = vmatpush3.bf16.msra.mxu0 %v1976_v3 }
 0x18b   : > { %v2730_v44 = vpop.permute.xlu0 %1154 }
 0x18c   : > { %v1163_v29 = vpop.permute.xlu1 %1162 }
 0x190   : > { %v1083_v59 = vpop.permute.xlu0 %1082 }
 0x191   : > { %v1183_v7 = vpop.permute.xlu1 %1182 }
 0x194   : > { %v1087_v14 = vpop.permute.xlu0 %1086 }
 0x196   : > { %v1103_v31 = vpop.permute.xlu1 %1102 }
 0x19b   : > { %v1067_v37 = vpop.permute.xlu1 %1066 }
 0x1a0   : > { %v2718_v32 = vpop.permute.xlu1 %1166 }
 0x1a5   : > { %v2720_v33 = vpop.permute.xlu1 %1186 }
 0x1aa   : > { %v1107_v34 = vpop.permute.xlu1 %1106 }
 0x1af   : > { %v2722_v38 = vpop.permute.xlu1 %1070 }
 0x1b4   : > { %v2724_v41 = vpop.permute.xlu1 %1170 }
 0x1b9   : > { %v2728_v42 = vpop.permute.xlu1 %1190 }
 0x1be   : > { %v2732_v47 = vpop.permute.xlu1 %1110 }
 0x1c3   : > { %v1075_v27 = vpop.permute.xlu1 %1074 }
 0x1c8   : > { %v1175_v0 = vpop.permute.xlu1 %1174 }
 0x238   : > { %v2814_v3 = vpop.f32.mrb[4].mxu0 }
 0x23f   : > { %v1801_v43 = vpop.f32.mrb[4].mxu1 }
 0x240   : > { %v1802_v45 = vpop.f32.mrb[5].mxu1 }
 0x241   : > { %v1803_v46 = vadd.f32 %v1802_v45, %v1801_v43 }
 0x243   : > { %v1007_v48 = vadd.f32 %v1803_v46, %v2590_v12  ;;  %v1804_v35 = vpop.f32.mrb[6].mxu1 }
 0x244   : > { %v1805_v50 = vpop.f32.mrb[7].mxu1 }
 0x245   : > { %vm1025_vm5 = vcmp.ge.f32.partialorder %v1007_v48, 0.0  ;;  %v1029_v12 = vmul.f32 0.01, %v1007_v48  ;;  %v1806_v54 = vadd.f32 %v1805_v50, %v1804_v35 }
 0x247   : > { %v2759_v61 = vsel %vm1025_vm5, %v1007_v48, %v1029_v12  ;;  %v1012_v62 = vadd.f32 %v2588_v36, %v1806_v54  ;;  %v1807_v2 = vpop.f32.mrb[8].mxu1  ;;  %v1195_v48 = vpop.permute.xlu1 %1194 }
 0x248   : > { %v1808_v5 = vpop.f32.mrb[9].mxu1  ;;  %v1097_v6 = vmul.f32 %v1083_v59, %v2759_v61  ;;  %v1177_v8 = vmul.f32 %v1163_v29, %v2759_v61  ;;  %v1077_v20 = vmul.f32 %v1063_v26, %v2759_v61  ;;  %v1157_v13 = vmul.f32 %v1143_v10, %v2759_v61 }
 0x249   : > { %vm1026_vm6 = vcmp.ge.f32.partialorder %v1012_v62, 0.0  ;;  %v1030_v28 = vmul.f32 0.01, %v1012_v62  ;;  %v1809_v9 = vadd.f32 %v1808_v5, %v1807_v2  ;;  %v1117_v21 = vmul.f32 %v1103_v31, %v2759_v61 }
 0x24a   : > { %v2118_v11 = vpack.i.bf16 %v1097_v6, %v1177_v8  ;;  %v2113_v58 = vpack.i.bf16 %v1077_v20, %v1157_v13  ;;  %v1197_v17 = vmul.f32 %v1183_v7, %v2759_v61 }
 0x24b   : > { %v2766_v30 = vsel %vm1026_vm6, %v1012_v62, %v1030_v28  ;;  %v1017_v36 = vadd.f32 %v1809_v9, %v2596_v40  ;;  %v1115_v51 = vpop.permute.xlu1 %1114 }
 0x24c   : > { %2119 = vrot.lane.b32.xlu1 %v2118_v11, %s2190_s29  ;;  %v1078_v15 = vmul.f32 %v1067_v37, %v2766_v30  ;;  %v1158_v1 = vmul.f32 %v1147_v16, %v2766_v30  ;;  %2114 = vrot.lane.b32.xlu0 %v2113_v58, %s2191_s30  ;;  %v1118_v40 = vmul.f32 %v1107_v34, %v2766_v30  ;;  %v1091_v16 = vpop.permute.xlu0 %1090 }
 0x24d   : > { %vm1027_vm7 = vcmp.ge.f32.partialorder %v1017_v36, 0.0  ;;  %v1031_v22 = vmul.f32 0.01, %v1017_v36  ;;  %v1198_v26 = vmul.f32 %v2720_v33, %v2766_v30  ;;  %v1098_v29 = vmul.f32 %v1087_v14, %v2766_v30 }
 0x24e   : > { %v1810_v63 = vpop.f32.mrb[10].mxu1  ;;  %v2128_v25 = vpack.i.bf16 %v1078_v15, %v1158_v1  ;;  %v1178_v7 = vmul.f32 %v2718_v32, %v2766_v30  ;;  %v2123_v10 = vpack.i.bf16 %v1117_v21, %v1197_v17 }
 0x24f   : > { %v1811_v23 = vpop.f32.mrb[11].mxu1  ;;  %v2781_v31 = vsel %vm1027_vm7, %v1017_v36, %v1031_v22  ;;  %v2138_v34 = vpack.i.bf16 %v1118_v40, %v1198_v26  ;;  %v1040_v18 = vpop.permute.xlu1 %1039 }
 0x250   : > { %v1812_v37 = vadd.f32 %v1811_v23, %v1810_v63  ;;  %2129 = vrot.lane.b32.xlu1 %v2128_v25, %s2191_s30  ;;  %2124 = vrot.lane.b32.xlu0 %v2123_v10, %s2192_s16  ;;  %v2133_v45 = vpack.i.bf16 %v1098_v29, %v1178_v7  ;;  %v1099_v33 = vmul.f32 %v1091_v16, %v2781_v31  ;;  %v1095_v12 = vpop.permute.xlu0 %1094 }
 0x251   : > { %v1179_v46 = vmul.f32 %v2724_v41, %v2781_v31  ;;  %v1079_v35 = vmul.f32 %v2722_v38, %v2781_v31  ;;  %v1159_v53 = vmul.f32 %v2726_v19, %v2781_v31  ;;  %v1119_v52 = vmul.f32 %v2732_v47, %v2781_v31 }
 0x252   : > { %v1022_v43 = vadd.f32 %v2594_v39, %v1812_v37  ;;  %v1199_v38 = vmul.f32 %v2728_v42, %v2781_v31  ;;  %v1057_v11 = vmul.f32 %v1040_v18, %v2759_v61 }
 0x253   : > { %v2148_v4 = vpack.i.bf16 %v1099_v33, %v1179_v46  ;;  %v2143_v50 = vpack.i.bf16 %v1079_v35, %v1159_v53  ;;  %v1127_v59 = vpop.permute.xlu1 %1126 }
 0x254   : > { %vm1028_vm8 = vcmp.ge.f32.partialorder %v1022_v43, 0.0  ;;  %v1032_v32 = vmul.f32 0.01, %v1022_v43  ;;  %2139 = vrot.lane.b32.xlu1 %v2138_v34, %s2192_s16  ;;  %2134 = vrot.lane.b32.xlu0 %v2133_v45, %s2190_s29  ;;  %v2153_v56 = vpack.i.bf16 %v1119_v52, %v1199_v38  ;;  %v1123_v24 = vpop.permute.xlu0 %1122  ;;  %v1138_v37 = vmul.f32 %v1127_v59, %v2766_v30 }
 0x255   : > { %v1137_v13 = vmul.f32 %v1123_v24, %v2759_v61 }
 0x256   : > { %v2794_v39 = vsel %vm1028_vm8, %v1022_v43, %v1032_v32 }
 0x257   : > { %v1080_v49 = vmul.f32 %v1075_v27, %v2794_v39  ;;  %v1160_v41 = vmul.f32 %v2730_v44, %v2794_v39  ;;  %v1120_v54 = vmul.f32 %v1115_v51, %v2794_v39  ;;  %v1200_v55 = vmul.f32 %v1195_v48, %v2794_v39  ;;  %v1131_v60 = vpop.permute.xlu1 %1130  ;;  %v2816_v27 = vpop.f32.mrb[5].mxu0 }
 0x258   : > { %2149 = vrot.lane.b32.xlu1 %v2148_v4, %s2190_s29  ;;  %2144 = vrot.lane.b32.xlu0 %v2143_v50, %s2191_s30  ;;  %v1100_v44 = vmul.f32 %v1095_v12, %v2794_v39  ;;  %v1180_v57 = vmul.f32 %v1175_v0, %v2794_v39  ;;  %v1045_v2 = vpop.permute.xlu0 %1044  ;;  %v2822_v8 = vpop.f32.mrb[6].mxu0 }
 0x259   : > { %v2158_v19 = vpack.i.bf16 %v1080_v49, %v1160_v41  ;;  %v2168_v42 = vpack.i.bf16 %v1120_v54, %v1200_v55  ;;  %v2824_v28 = vpop.f32.mrb[7].mxu0  ;;  %v1058_v10 = vmul.f32 %v1045_v2, %v2766_v30  ;;  %v1139_v41 = vmul.f32 %v1131_v60, %v2781_v31 }
 0x25a   : > { %v2163_v47 = vpack.i.bf16 %v1100_v44, %v1180_v57 }
 0x25b   : > { %v1050_v62 = vpop.permute.xlu1 %1049 }
 0x25c   : > { %2159 = vrot.lane.b32.xlu1 %v2158_v19, %s2191_s30  ;;  %2154 = vrot.lane.b32.xlu0 %v2153_v56, %s2192_s16  ;;  %v2820_v6 = vpop.permute.xlu0 %1054  ;;  %v1059_v50 = vmul.f32 %v1050_v62, %v2781_v31 }
 0x25d   : > { %v1060_v62 = vmul.f32 %v2820_v6, %v2794_v39 }
 0x25f   : > { %v2818_v5 = vpop.permute.xlu1 %1134 }
 0x260   : > { %2169 = vrot.lane.b32.xlu1 %v2168_v42, %s2192_s16  ;;  %2164 = vrot.lane.b32.xlu0 %v2163_v47, %s2190_s29  ;;  %v1140_v2 = vmul.f32 %v2818_v5, %v2794_v39  ;;  %v1544_v39 = vld [vmem:[%s2899_s9] sm:$0xff]  ;;  %v1545_v5 = vld [vmem:[%s2899_s9 + $0x8] sm:$0xff] }
 0x2be   : > { %v2120_v9 = vpop.permute.xlu1 %2119  ;;  %v2115_v20 = vpop.permute.xlu0 %2114 }
 0x2bf   : > { %v2117_v36 = vunpack.i.h.bf16 %v2115_v20  ;;  %v2116_v14 = vunpack.i.l.bf16 %v2115_v20  ;;  %v2122_v58 = vunpack.i.h.bf16 %v2120_v9  ;;  %v2121_v15 = vunpack.i.l.bf16 %v2120_v9 }
 0x2c1   : > { %v1297_v21 = vsel %vm786_vm2, %v1057_v11, %v2117_v36  ;;  %v1309_v22 = vsel %vm786_vm2, %v1137_v13, %v2116_v14 }
 0x2c2   : > { %v2130_v17 = vpop.permute.xlu1 %2129  ;;  %v2125_v1 = vpop.permute.xlu0 %2124  ;;  %v1313_v25 = vsel %vm791_vm3, %v1309_v22, %v2121_v15  ;;  %v1301_v26 = vsel %vm791_vm3, %v1297_v21, %v2122_v58  ;;  %v1978_v22 = vpack.c.bf16 %v1545_v5, %v1544_v39 }
 0x2c3   : > { %v2127_v0 = vunpack.i.h.bf16 %v2125_v1  ;;  %v2126_v63 = vunpack.i.l.bf16 %v2125_v1  ;;  %v2132_v40 = vunpack.i.h.bf16 %v2130_v17  ;;  %v2131_v23 = vunpack.i.l.bf16 %v2130_v17  ;;  %v1546_v1 = vld [vmem:[%s2899_s9 + $0x10] sm:$0xff] }
 0x2c4   : > { %1979 = vmatprep.subr.bf16.mxu1 %v1978_v22 }
 0x2c5   : > { %v1317_v61 = vsel %vm796_vm4, %v1313_v25, %v2126_v63  ;;  %v1305_v7 = vsel %vm796_vm4, %v1301_v26, %v2127_v0  ;;  %v1310_v46 = vsel %vm786_vm2, %v1138_v37, %v2131_v23  ;;  %v1298_v48 = vsel %vm786_vm2, %v1058_v10, %v2132_v40  ;;  %1981 = vmatpush3.bf16.msra.mxu1 %v1978_v22  ;;  %v1547_v0 = vld [vmem:[%s2899_s9 + $0x18] sm:$0xff] }
 0x2c6   : > { %v2140_v29 = vpop.permute.xlu1 %2139  ;;  %v2135_v34 = vpop.permute.xlu0 %2134  ;;  %1511 = vmatprep.mubr.f32.mxu0 %v1317_v61  ;;  %v1982_v63 = vpack.c.bf16 %v1547_v0, %v1546_v1 }
 0x2c7   : > { %v2142_v16 = vunpack.i.h.bf16 %v2140_v29  ;;  %v2141_v43 = vunpack.i.l.bf16 %v2140_v29  ;;  %v2137_v45 = vunpack.i.h.bf16 %v2135_v34  ;;  %v2136_v33 = vunpack.i.l.bf16 %v2135_v34  ;;  %1512 = vmatmul.mubr.f32.vlgmr.msra.gmra.mrb[8].mxu0 %v1305_v7 }
 0x2c8   : > { %1983 = vmatprep.subr.bf16.mxu1 %v1982_v63 }
 0x2c9   : > { %v1314_v35 = vsel %vm791_vm3, %v1310_v46, %v2136_v33  ;;  %v1302_v53 = vsel %vm791_vm3, %v1298_v48, %v2137_v45  ;;  %1985 = vmatpush3.bf16.msra.mxu1 %v1982_v63 }
 0x2ca   : > { %v2150_v32 = vpop.permute.xlu1 %2149  ;;  %v2145_v4 = vpop.permute.xlu0 %2144  ;;  %v1318_v49 = vsel %vm796_vm4, %v1314_v35, %v2141_v43  ;;  %v1306_v30 = vsel %vm796_vm4, %v1302_v53, %v2142_v16 }
 0x2cb   : > { %v2147_v52 = vunpack.i.h.bf16 %v2145_v4  ;;  %v2146_v38 = vunpack.i.l.bf16 %v2145_v4  ;;  %1516 = vmatprep.mubr.f32.mxu0 %v1318_v49  ;;  %v2152_v19 = vunpack.i.h.bf16 %v2150_v32  ;;  %v2151_v51 = vunpack.i.l.bf16 %v2150_v32 }
 0x2cc   : > { %1517 = vmatmul.mubr.f32.gmra.mrb[10].mxu0 %v1306_v30 }
 0x2cd   : > { %v1311_v54 = vsel %vm786_vm2, %v1139_v41, %v2146_v38  ;;  %v1299_v55 = vsel %vm786_vm2, %v1059_v50, %v2147_v52  ;;  %v1748_v41 = vld [vmem:[%s2900_s10] ss:$0 sm:$0xff] }
 0x2ce   : > { %v2160_v12 = vpop.permute.xlu1 %2159  ;;  %v2155_v56 = vpop.permute.xlu0 %2154  ;;  %v1315_v18 = vsel %vm791_vm3, %v1311_v54, %v2151_v51  ;;  %v1303_v31 = vsel %vm791_vm3, %v1299_v55, %v2152_v19 }
 0x2cf   : > { %v2157_v44 = vunpack.i.h.bf16 %v2155_v56  ;;  %v2156_v57 = vunpack.i.l.bf16 %v2155_v56  ;;  %v2162_v42 = vunpack.i.h.bf16 %v2160_v12  ;;  %v2161_v47 = vunpack.i.l.bf16 %v2160_v12 }
 0x2d1   : > { %v1319_v60 = vsel %vm796_vm4, %v1315_v18, %v2156_v57  ;;  %v1307_v24 = vsel %vm796_vm4, %v1303_v31, %v2157_v44  ;;  %v1312_v14 = vsel %vm786_vm2, %v1140_v2, %v2161_v47  ;;  %v1300_v58 = vsel %vm786_vm2, %v1060_v62, %v2162_v42 }
 0x2d2   : > { %v2170_v59 = vpop.permute.xlu1 %2169  ;;  %v2165_v11 = vpop.permute.xlu0 %2164  ;;  %1521 = vmatprep.mubr.f32.mxu0 %v1319_v60 }
 0x2d3   : > { %v2172_v9 = vunpack.i.h.bf16 %v2170_v59  ;;  %v2171_v20 = vunpack.i.l.bf16 %v2170_v59  ;;  %v2167_v13 = vunpack.i.h.bf16 %v2165_v11  ;;  %v2166_v36 = vunpack.i.l.bf16 %v2165_v11  ;;  %1522 = vmatmul.mubr.f32.gmra.mrb[12].mxu0 %v1307_v24 }
 0x2d5   : > { %v1316_v15 = vsel %vm791_vm3, %v1312_v14, %v2166_v36  ;;  %v1304_v21 = vsel %vm791_vm3, %v1300_v58, %v2167_v13 }
 0x2d6   : > { %v1320_v6 = vsel %vm796_vm4, %v1316_v15, %v2171_v20  ;;  %v1308_v17 = vsel %vm796_vm4, %v1304_v21, %v2172_v9 }
 0x2d7   : > { %1526 = vmatprep.mubr.f32.mxu0 %v1320_v6 }
 0x2d8   : > { %1527 = vmatmul.mubr.f32.gmra.mrb[14].mxu0 %v1308_v17 }
 0x39a   : > { %v1850_v40 = vpop.f32.mrb[8].mxu0 }
 0x39b   : > { %v1851_v23 = vpop.f32.mrb[9].mxu0 }
 0x39c   : > { %v1852_v25 = vadd.f32 %v1851_v23, %v1850_v40 }
 0x39e   : > { %v1514_v26 = vadd.f32 %v1852_v25, %v2816_v27 }
 0x39f   : > { %v1853_v29 = vpop.f32.mrb[10].mxu0 }
 0x3a0   : > { %v1536_v61 = vmul.f32 0.01, %v1514_v26  ;;  %v1854_v7 = vpop.f32.mrb[11].mxu0  ;;  %vm1532_vm9 = vcmp.ge.f32.partialorder %v1514_v26, 0.0 }
 0x3a1   : > { %v1855_v37 = vadd.f32 %v1854_v7, %v1853_v29 }
 0x3a2   : > { %v1540_v10 = vsel %vm1532_vm9, %v1514_v26, %v1536_v61 }
 0x3a3   : > { %v1519_v16 = vadd.f32 %v2814_v3, %v1855_v37  ;;  %1904 = vmatprep.mubr.msk.f32.mxu1 %vm786_vm2, %v1540_v10 }
 0x3a5   : > { %vm1533_vm10 = vcmp.ge.f32.partialorder %v1519_v16, 0.0  ;;  %v1537_v43 = vmul.f32 0.01, %v1519_v16 }
 0x3a6   : > { %v1856_v34 = vpop.f32.mrb[12].mxu0 }
 0x3a7   : > { %v1541_v45 = vsel %vm1533_vm10, %v1519_v16, %v1537_v43  ;;  %v1857_v33 = vpop.f32.mrb[13].mxu0 }
 0x3a8   : > { %v1858_v46 = vadd.f32 %v1857_v33, %v1856_v34  ;;  %1905 = vmatmul.mubr.msk.f32.vlgmr.msra.gmra.mrb[12].mxu1 %vm786_vm2, %v1541_v45 }
 0x3aa   : > { %v1524_v27 = vadd.f32 %v1858_v46, %v2824_v28 }
 0x3ab   : > { %v1859_v48 = vpop.f32.mrb[14].mxu0 }
 0x3ac   : > { %v1538_v32 = vmul.f32 0.01, %v1524_v27  ;;  %v1860_v35 = vpop.f32.mrb[15].mxu0  ;;  %vm1534_vm11 = vcmp.ge.f32.partialorder %v1524_v27, 0.0 }
 0x3ad   : > { %v1861_v53 = vadd.f32 %v1860_v35, %v1859_v48 }
 0x3ae   : > { %v1542_v4 = vsel %vm1534_vm11, %v1524_v27, %v1538_v32 }
 0x3af   : > { %v1529_v3 = vadd.f32 %v2822_v8, %v1861_v53  ;;  %1907 = vmatprep.mubr.msk.f32.mxu1 %vm786_vm2, %v1542_v4 }
 0x3b1   : > { %v1539_v49 = vmul.f32 0.01, %v1529_v3  ;;  %vm1535_vm12 = vcmp.ge.f32.partialorder %v1529_v3, 0.0 }
 0x3b3   : > { %v1543_v30 = vsel %vm1535_vm12, %v1529_v3, %v1539_v49 }
 0x3b4   : > { %1908 = vmatmul.mubr.msk.f32.gmra.mrb[14].mxu1 %vm786_vm2, %v1543_v30 }
 0x47b   : > { %v1906_v28 = vpop.f32.mrb[12].mxu1 }
 0x47c   : > { %v1639_v50 = vadd.f32 %v1906_v28, %v1748_v41  ;;  %v1633_v52 = vpop.f32.mrb[13].mxu1 }
 0x47d   : > { %v1634_v8 = vadd.f32 %v1748_v41, %v1633_v52 }
 0x47e   : > { %1654 = vst.msk [vmem:[%s406_s15 + $0x8] sm:$0xff] %vm1652_vm13, %v1639_v50 }
 0x47f   : > { %1653 = vst.msk [vmem:[%s406_s15] sm:$0xff] %vm1652_vm13, %v1634_v8 }
 0x487   : > { %v1909_v38 = vpop.f32.mrb[14].mxu1 }
 0x488   : > { %v1649_v19 = vadd.f32 %v1909_v38, %v1748_v41  ;;  %v1643_v51 = vpop.f32.mrb[15].mxu1 }
 0x489   : > { %v1644_v12 = vadd.f32 %v1748_v41, %v1643_v51 }
 0x48a   : > { %1656 = vst.msk [vmem:[%s406_s15 + $0x18] sm:$0xff] %vm1652_vm13, %v1649_v19 }
 0x48b   : > { %1655 = vst.msk [vmem:[%s406_s15 + $0x10] sm:$0xff] %vm1652_vm13, %v1644_v12 }
 0x48c PF: > { %s21_s17 = sadd.s32 1, %s2180_s17  }
 0x48d   : > { %p18_p4 = scmp.ge.s32.totalorder %s21_s17, 4  }
 0x48f   :  { %20 = sbr.rel (!%p18_p4) target bundleno = 1 (0x1), region = 97 }

</bundles_post_ra>
